<compile_context>
chip_gen: v6e
topology: v6e:2x2x1
jax: 0.10.0
libtpu: 0.0.40
codegen_flags: <defaults>
</compile_context>

<pallas_src>
import jax
import jax.numpy as jnp
from jax.experimental import pallas as pl
from jax.experimental.pallas import tpu as pltpu


def _round_up(n: int, m: int) -> int:
    return ((n + m - 1) // m) * m


def _sigmoid(z):
    # Single EUP transcendental per call (tanh); avoids exp + VALU divide.
    return 0.5 * jnp.tanh(0.5 * z) + 0.5


def mlp_kernel(params_ref, x_ref, out_ref):
    # x_ref:   (2, r_blk, L) f32 in VMEM; batch packed over sublanes x lanes.
    # out_ref: (r_blk, L) f32.
    # params_ref: (9,) f32 in SMEM:
    #   [w1_00, w1_01, w1_10, w1_11, b1_0, b1_1, w2_0, w2_1, b2_0]
    #   where w1_ij = weight from input i to hidden j, w2_i = hidden i -> out.
    x0 = x_ref[0]  # (r_blk, L), fully packed vregs
    x1 = x_ref[1]

    w1_00 = params_ref[0]
    w1_01 = params_ref[1]
    w1_10 = params_ref[2]
    w1_11 = params_ref[3]
    b1_0 = params_ref[4]
    b1_1 = params_ref[5]
    w2_0 = params_ref[6]
    w2_1 = params_ref[7]
    b2_0 = params_ref[8]

    # fc1 + sigmoid: VPU FMAs + EUP tanh, no MXU.
    h0 = _sigmoid(x0 * w1_00 + x1 * w1_10 + b1_0)
    h1 = _sigmoid(x0 * w1_01 + x1 * w1_11 + b1_1)

    # fc2 + sigmoid, dense (8,128)-tiled store.
    out_ref[...] = _sigmoid(h0 * w2_0 + h1 * w2_1 + b2_0)


def neural_network_forward(x, w1, b1, w2, b2, *, lane_width=512, max_block_rows=512):
    """y = sigmoid(sigmoid(x @ w1.T + b1) @ w2.T + b2), x: (B, 2) -> (B, 1).

    Weights in PyTorch nn.Linear layout:
      w1: (2, 2) = (out, in), b1: (2,), w2: (1, 2) = (out, in), b2: (1,).
    """
    B = x.shape[0]

    # Lane width: multiple of 128; shrink for tiny batches to limit padding.
    L = min(lane_width, _round_up(B, 128))
    # Rows of L lanes needed to hold the batch, rounded to a sublane multiple.
    rows_needed = _round_up(pl.cdiv(B, L), 8)

    # Block rows: big enough to amortize the ~0.35 us per-step overhead ...
    r_blk = min(max_block_rows, rows_needed)
    # ... but keep >=2 grid steps when there's enough work so the "parallel"
    # grid axis can shard across v7x's two TensorCores.
    if rows_needed >= 16 and rows_needed // r_blk < 2:
        r_blk = _round_up(pl.cdiv(rows_needed, 2), 8)

    R = _round_up(rows_needed, r_blk)
    Bp = R * L
    num_blocks = R // r_blk

    # Layout plumbing (one fused XLA op): pad batch, go feature-major, and
    # split batch over (sublane, lane) axes so kernel vregs are fully packed.
    x_pad = jnp.pad(x.astype(jnp.float32), ((0, Bp - B), (0, 0)))  # (Bp, 2)
    x_t = jnp.transpose(x_pad).reshape(2, R, L)

    # Flat scalar parameter vector (order documented in mlp_kernel).
    w1_in_out = jnp.transpose(w1.astype(jnp.float32))  # (in, out)
    params = jnp.concatenate(
        [
            w1_in_out.reshape(-1),               # w1_00, w1_01, w1_10, w1_11
            b1.astype(jnp.float32).reshape(-1),  # b1_0, b1_1
            w2.astype(jnp.float32).reshape(-1),  # w2_0, w2_1
            b2.astype(jnp.float32).reshape(-1),  # b2_0
        ]
    )  # (9,)

    out = pl.pallas_call(
        mlp_kernel,
        out_shape=jax.ShapeDtypeStruct((R, L), jnp.float32),
        grid=(num_blocks,),
        in_specs=[
            # Weight/bias scalars resident in SMEM (no per-step tile DMAs).
            pl.BlockSpec(memory_space=pltpu.MemorySpace.SMEM),
            # x tiles, double-buffered HBM->VMEM by BlockSpec.
            pl.BlockSpec((2, r_blk, L), lambda i: (0, i, 0)),
        ],
        out_specs=pl.BlockSpec((r_blk, L), lambda i: (i, 0)),
        compiler_params=pltpu.CompilerParams(
            dimension_semantics=("parallel",),
            # ~6 MiB double-buffered footprint at default block size; explicit
            # limit keeps larger blocks safe on v5e's 16 MiB default scope.
            vmem_limit_bytes=32 * 1024 * 1024,
        ),
    )(params, x_t)

    # Back to PyTorch layout (B, 1), dropping batch padding.
    return out.reshape(Bp)[:B].reshape(B, 1)


def init_params(key):
    # Mimic PyTorch nn.Linear init: U(-1/sqrt(fan_in), 1/sqrt(fan_in)),
    # weights stored in PyTorch (out, in) layout.
    k1, k2, k3, k4 = jax.random.split(key, 4)
    bound = 1.0 / jnp.sqrt(2.0)  # fan_in = 2 for both layers
    w1 = jax.random.uniform(k1, (2, 2), jnp.float32, -bound, bound)  # (out, in)
    b1 = jax.random.uniform(k2, (2,), jnp.float32, -bound, bound)
    w2 = jax.random.uniform(k3, (1, 2), jnp.float32, -bound, bound)  # (out, in)
    b2 = jax.random.uniform(k4, (1,), jnp.float32, -bound, bound)
    return w1, b1, w2, b2


if __name__ == "__main__":
    key = jax.random.PRNGKey(0)
    key_x, key_p = jax.random.split(key)

    B = 8
    x = jax.random.normal(key_x, (B, 2), jnp.float32)
    w1, b1, w2, b2 = init_params(key_p)

    out = neural_network_forward(x, w1, b1, w2, b2)
    out = jax.block_until_ready(out)

    # Pure-JAX reference of the PyTorch forward semantics.
    h_ref = jax.nn.sigmoid(x @ w1.T + b1)
    y_ref = jax.nn.sigmoid(h_ref @ w2.T + b2)
    assert out.shape == (B, 1)
    assert jnp.allclose(out, y_ref, atol=1e-5, rtol=1e-5)

    print("KERNEL_OK")
</pallas_src>

<mosaic_0001>
module attributes {stable_mosaic.version = 11 : i64} {
  func.func @mlp_kernel(%arg0: i32, %arg1: memref<9xf32, #tpu.memory_space<smem>>, %arg2: memref<2x8x128xf32, #tpu.memory_space<vmem>>, %arg3: memref<8x128xf32, #tpu.memory_space<vmem>>) attributes {dimension_semantics = [#tpu.dimension_semantics<parallel>], iteration_bounds = array<i64: 1>, scalar_prefetch = 0 : i64, scratch_operands = 0 : i64, tpu.core_type = #tpu.core_type<tc>, window_params = [{transform_indices = @transform_0, window_bounds = array<i64: 9>}, {transform_indices = @transform_1, window_bounds = array<i64: 2, 8, 128>}, {transform_indices = @transform_2, window_bounds = array<i64: 8, 128>}]} {
    %c0 = arith.constant 0 : index
    %c0_0 = arith.constant 0 : index
    %c0_1 = arith.constant 0 : index
    %0 = vector.load %arg2[%c0, %c0_0, %c0_1] : memref<2x8x128xf32, #tpu.memory_space<vmem>>, vector<1x8x128xf32>
    %1 = vector.shape_cast %0 : vector<1x8x128xf32> to vector<8x128xf32>
    %c1 = arith.constant 1 : index
    %c0_2 = arith.constant 0 : index
    %c0_3 = arith.constant 0 : index
    %2 = vector.load %arg2[%c1, %c0_2, %c0_3] : memref<2x8x128xf32, #tpu.memory_space<vmem>>, vector<1x8x128xf32>
    %3 = vector.shape_cast %2 : vector<1x8x128xf32> to vector<8x128xf32>
    %c0_4 = arith.constant 0 : index
    %4 = memref.load %arg1[%c0_4] : memref<9xf32, #tpu.memory_space<smem>>
    %c1_5 = arith.constant 1 : index
    %5 = memref.load %arg1[%c1_5] : memref<9xf32, #tpu.memory_space<smem>>
    %c2 = arith.constant 2 : index
    %6 = memref.load %arg1[%c2] : memref<9xf32, #tpu.memory_space<smem>>
    %c3 = arith.constant 3 : index
    %7 = memref.load %arg1[%c3] : memref<9xf32, #tpu.memory_space<smem>>
    %c4 = arith.constant 4 : index
    %8 = memref.load %arg1[%c4] : memref<9xf32, #tpu.memory_space<smem>>
    %c5 = arith.constant 5 : index
    %9 = memref.load %arg1[%c5] : memref<9xf32, #tpu.memory_space<smem>>
    %c6 = arith.constant 6 : index
    %10 = memref.load %arg1[%c6] : memref<9xf32, #tpu.memory_space<smem>>
    %c7 = arith.constant 7 : index
    %11 = memref.load %arg1[%c7] : memref<9xf32, #tpu.memory_space<smem>>
    %c8 = arith.constant 8 : index
    %12 = memref.load %arg1[%c8] : memref<9xf32, #tpu.memory_space<smem>>
    %13 = vector.broadcast %4 : f32 to vector<8x128xf32>
    %14 = arith.mulf %1, %13 : vector<8x128xf32>
    %15 = vector.broadcast %6 : f32 to vector<8x128xf32>
    %16 = arith.mulf %3, %15 : vector<8x128xf32>
    %17 = arith.addf %14, %16 : vector<8x128xf32>
    %18 = vector.broadcast %8 : f32 to vector<8x128xf32>
    %19 = arith.addf %17, %18 : vector<8x128xf32>
    %cst = arith.constant 5.000000e-01 : f32
    %20 = vector.broadcast %cst : f32 to vector<8x128xf32>
    %21 = arith.mulf %20, %19 : vector<8x128xf32>
    %22 = math.tanh %21 : vector<8x128xf32>
    %cst_6 = arith.constant 5.000000e-01 : f32
    %23 = vector.broadcast %cst_6 : f32 to vector<8x128xf32>
    %24 = arith.mulf %23, %22 : vector<8x128xf32>
    %cst_7 = arith.constant 5.000000e-01 : f32
    %25 = vector.broadcast %cst_7 : f32 to vector<8x128xf32>
    %26 = arith.addf %24, %25 : vector<8x128xf32>
    %27 = vector.broadcast %5 : f32 to vector<8x128xf32>
    %28 = arith.mulf %1, %27 : vector<8x128xf32>
    %29 = vector.broadcast %7 : f32 to vector<8x128xf32>
    %30 = arith.mulf %3, %29 : vector<8x128xf32>
    %31 = arith.addf %28, %30 : vector<8x128xf32>
    %32 = vector.broadcast %9 : f32 to vector<8x128xf32>
    %33 = arith.addf %31, %32 : vector<8x128xf32>
    %cst_8 = arith.constant 5.000000e-01 : f32
    %34 = vector.broadcast %cst_8 : f32 to vector<8x128xf32>
    %35 = arith.mulf %34, %33 : vector<8x128xf32>
    %36 = math.tanh %35 : vector<8x128xf32>
    %cst_9 = arith.constant 5.000000e-01 : f32
    %37 = vector.broadcast %cst_9 : f32 to vector<8x128xf32>
    %38 = arith.mulf %37, %36 : vector<8x128xf32>
    %cst_10 = arith.constant 5.000000e-01 : f32
    %39 = vector.broadcast %cst_10 : f32 to vector<8x128xf32>
    %40 = arith.addf %38, %39 : vector<8x128xf32>
    %41 = vector.broadcast %10 : f32 to vector<8x128xf32>
    %42 = arith.mulf %26, %41 : vector<8x128xf32>
    %43 = vector.broadcast %11 : f32 to vector<8x128xf32>
    %44 = arith.mulf %40, %43 : vector<8x128xf32>
    %45 = arith.addf %42, %44 : vector<8x128xf32>
    %46 = vector.broadcast %12 : f32 to vector<8x128xf32>
    %47 = arith.addf %45, %46 : vector<8x128xf32>
    %cst_11 = arith.constant 5.000000e-01 : f32
    %48 = vector.broadcast %cst_11 : f32 to vector<8x128xf32>
    %49 = arith.mulf %48, %47 : vector<8x128xf32>
    %50 = math.tanh %49 : vector<8x128xf32>
    %cst_12 = arith.constant 5.000000e-01 : f32
    %51 = vector.broadcast %cst_12 : f32 to vector<8x128xf32>
    %52 = arith.mulf %51, %50 : vector<8x128xf32>
    %cst_13 = arith.constant 5.000000e-01 : f32
    %53 = vector.broadcast %cst_13 : f32 to vector<8x128xf32>
    %54 = arith.addf %52, %53 : vector<8x128xf32>
    %c0_14 = arith.constant 0 : index
    %c0_15 = arith.constant 0 : index
    %55 = vector.load %arg3[%c0_14, %c0_15] : memref<8x128xf32, #tpu.memory_space<vmem>>, vector<8x128xf32>
    tpu.vector_store %arg3[%c0_14, %c0_15], %54 {strides = array<i32>} : memref<8x128xf32, #tpu.memory_space<vmem>>, vector<8x128xf32>,
    return
  }
  func.func @transform_0(%arg0: i32) -> i32 {
    %c0_i32 = arith.constant 0 : i32
    %c0_i32_0 = arith.constant 0 : i32
    return %c0_i32 : i32
  }
  func.func @transform_1(%arg0: i32) -> (i32, i32, i32) {
    %c0_i32 = arith.constant 0 : i32
    %c0_i32_0 = arith.constant 0 : i32
    %c0_i32_1 = arith.constant 0 : i32
    return %c0_i32, %arg0, %c0_i32_0 : i32, i32, i32
  }
  func.func @transform_2(%arg0: i32) -> (i32, i32) {
    %c0_i32 = arith.constant 0 : i32
    %c0_i32_0 = arith.constant 0 : i32
    return %arg0, %c0_i32 : i32, i32
  }
}

</mosaic_0001>

<bundles_post_ra>
// kernel: tpu_custom_call.1
= control target key start
LH: loop header
LB: loop body
LE: loop exit
PB: predicated region body
PF: predicated region fallthrough
CT: control target
= control target key end

     0   :  { %7 = vsyncpa [#allocation5], 0  ;;  %s201_s0 = inlined_call_operand.hbm [shape: f32[9], index: 0, kind: input, shape index: {}]   ;;  %s202_s1 = inlined_call_operand.hbm [shape: f32[2,8,128], index: 1, kind: input, shape index: {}]   ;;  %s203_s2 = inlined_call_operand.hbm [shape: f32[8,128], index: 2, kind: output, shape index: {}]  }
   0x1   :  { %8 = vsyncpa [#allocation3], 0 }
   0x2   :  { %9 = vsyncpa [#allocation4], 0  ;;  %s172_s9 = smov [#allocation2]   ;;  %s173_s12 = smov [#allocation6]  }
   0x3   :  { %17 = dma.hbm_to_smem %s201_s0, 16, %s172_s9, [#allocation5]  }
   0x4   :  { %s23_s13 = sshll.u32 %s173_s12, 4  ;;  %s24_s13 = int_to_ptr.vmem [resolvable:$true] %s23_s13 }
   0x5   :  { %s134_s14 = scalar_lea.vmem %s24_s13, 256  ;;  %p139_p1 = scmp.lt.s32.totalorder %s24_s13, %s24_s13 }
   0x6   :  { %p135_p0 = scmp.ne.s32.totalorder %s24_s13, %s134_s14  ;;  %p140_p2 = scmp.lt.s32.totalorder %s134_s14, %s134_s14 }
   0x8   :  { %p141_p3 = por %p140_p2, %p139_p1 }
   0xa   :  { %p142_p4 = pnand %p141_p3, %p135_p0 }
   0xc   :  { %145 = shalt.err (!%p142_p4)
}
   0xd   :  { %s174_s15 = smov 128   ;;  %s175_s16 = smov 8  }
   0xe   :  { %29 = dma.hbm_to_vmem [thread:$0]  %s202_s1, 256, %s24_s13, [#allocation3], %s174_s15, %s174_s15, %s175_s16  }
   0xf   :  { %166 = dma.done.wait [#allocation5], 16  }
  0x10   :  { %167 = vsyncadd [#allocation5], 4294967280 }
  0x11   :  { %168 = dma.done.wait [#allocation3], 256  }
  0x12   :  { %169 = vsyncadd [#allocation3], 4294967040 }
  0x13   :  { %36 = sfence }
  0x14   :  { %s40_s0 = sld [smem:[#allocation2]]  ;;  %v37_v0 = vld [vmem:[#allocation6] sm:$0xff]  ;;  %v39_v1 = vld [vmem:[#allocation6 + $0x8] sm:$0xff]  ;;  %s176_s26 = smov [#allocation7]  }
  0x15   :  { %s99_s19 = sld [smem:[#allocation2 + $0x1]]  ;;  %s89_s27 = sshll.u32 %s176_s26, 4  ;;  %s90_s27 = int_to_ptr.vmem [resolvable:$true] %s89_s27 }
  0x16   :  { %s100_s20 = sld [smem:[#allocation2 + $0x2]]  ;;  %s146_s28 = scalar_lea.vmem %s90_s27, 128 }
  0x17   :  { %s101_s21 = sld [smem:[#allocation2 + $0x3]]  ;;  %p147_p5 = scmp.ne.s32.totalorder %s90_s27, %s146_s28 }
  0x18   :  { %s102_s22 = sld [smem:[#allocation2 + $0x4]]  ;;  %p151_p6 = scmp.lt.s32.totalorder %s90_s27, %s90_s27 }
  0x19   :  { %s103_s23 = sld [smem:[#allocation2 + $0x5]]  ;;  %p152_p7 = scmp.lt.s32.totalorder %s146_s28, %s146_s28 }
  0x1a   :  { %v49_v2 = vstv %s40_s0  ;;  %s104_s1 = sld [smem:[#allocation2 + $0x6]] }
  0x1b   :  { %v50_v3 = vmul.f32 %v49_v2, %v37_v0  ;;  %v60_v4 = vstv %s99_s19  ;;  %s105_s24 = sld [smem:[#allocation2 + $0x7]]  ;;  %p153_p8 = por %p152_p7, %p151_p6 }
  0x1c   :  { %v51_v5 = vstv %s100_s20  ;;  %v61_v6 = vmul.f32 %v60_v4, %v37_v0  ;;  %s106_s25 = sld [smem:[#allocation2 + $0x8]] }
  0x1d   :  { %v52_v7 = vmul.f32 %v51_v5, %v39_v1  ;;  %v62_v8 = vstv %s101_s21  ;;  %p154_p9 = pnand %p153_p8, %p147_p5 }
  0x1e   :  { %v54_v9 = vstv %s102_s22  ;;  %v63_v10 = vmul.f32 %v62_v8, %v39_v1 }
  0x1f   :  { %v53_v11 = vadd.f32 %v52_v7, %v50_v3  ;;  %v65_v12 = vstv %s103_s23 }
  0x20   :  { %v64_v13 = vadd.f32 %v63_v10, %v61_v6  ;;  %v71_v22 = vstv %s104_s1 }
  0x21   :  { %v55_v14 = vadd.f32 %v54_v9, %v53_v11  ;;  %v73_v24 = vstv %s105_s24 }
  0x22   :  { %v66_v15 = vadd.f32 %v65_v12, %v64_v13  ;;  %v76_v28 = vstv %s106_s25 }
  0x23   :  { %v56_v16 = vmul.f32 0.5, %v55_v14 }
  0x24   :  { %v67_v17 = vmul.f32 0.5, %v66_v15 }
  0x25   :  { %112 = vtanh.f32 %v56_v16 }
  0x26   :  { %114 = vtanh.f32 %v67_v17 }
  0x32   :  { %v113_v18 = vpop.eup %112 }
  0x33   :  { %v115_v19 = vpop.eup %114  ;;  %v58_v20 = vmul.f32 0.5, %v113_v18 }
  0x34   :  { %v69_v21 = vmul.f32 0.5, %v115_v19 }
  0x35   :  { %v59_v23 = vadd.f32 0.5, %v58_v20 }
  0x36   :  { %v70_v25 = vadd.f32 0.5, %v69_v21 }
  0x37   :  { %v72_v26 = vmul.f32 %v71_v22, %v59_v23 }
  0x38   :  { %v74_v27 = vmul.f32 %v73_v24, %v70_v25 }
  0x3a   :  { %v75_v29 = vadd.f32 %v74_v27, %v72_v26 }
  0x3c   :  { %v77_v30 = vadd.f32 %v76_v28, %v75_v29 }
  0x3e   :  { %v78_v31 = vmul.f32 0.5, %v77_v30 }
  0x40   :  { %116 = vtanh.f32 %v78_v31 }
  0x4d   :  { %v117_v32 = vpop.eup %116 }
  0x4e   :  { %v80_v33 = vmul.f32 0.5, %v117_v32 }
  0x50   :  { %v81_v34 = vadd.f32 0.5, %v80_v33 }
  0x52   :  { %82 = vst [vmem:[#allocation7] sm:$0xff] %v81_v34 }
  0x53   :  { %157 = shalt.err (!%p154_p9)
}
  0x54   :  { %92 = dma.vmem_to_hbm [thread:$0]  %s90_s27, 128, %s203_s2, [#allocation4]  }
  0x55   :  { %170 = dma.done.wait [#allocation4], 128  }
  0x56   :  { %171 = vsyncadd [#allocation4], 4294967168 }
  0x57   :  { %96 = vsyncpa [#allocation3], 1 }
  0x58   :  { %97 = vsyncpa [#allocation4], 1 }
  0x59   :  { %98 = vsyncpa [#allocation5], 1 }

</bundles_post_ra>
